<compile_context>
chip_gen: v6e
topology: v6e:2x2x1
jax: 0.10.0
libtpu: 0.0.40
codegen_flags: <defaults>
</compile_context>

<pallas_src>
import functools

import jax
import jax.numpy as jnp
from jax import lax
from jax.experimental import pallas as pl
from jax.experimental.pallas import tpu as pltpu

MAT_DIFF_LOSS_SCALE = 0.001


def _round_up(x, m):
    return ((x + m - 1) // m) * m


def _num_tensorcores():
    """Best-effort TensorCore count (2 on v7x / megacore parts, else 1)."""
    try:
        info = pltpu.get_tpu_info()
        for attr in ("num_cores", "tensorcores_per_chip", "num_tensorcores",
                     "cores_per_chip"):
            try:
                v = int(getattr(info, attr, 0) or 0)
            except Exception:
                v = 0
            if v > 0:
                return min(2, v)
    except Exception:
        pass
    try:
        v = int(getattr(jax.devices()[0], "num_cores", 0) or 0)
        if v > 0:
            return min(2, v)
    except Exception:
        pass
    return 1


def _nll_kernel(pred_ref, tgt_ref, out_ref, acc_ref, *, inv_n):
    # grid = (n_split, tiles_per_split); axis 0 "parallel", axis 1 "arbitrary".
    i = pl.program_id(1)
    n_inner = pl.num_programs(1)

    @pl.when(i == 0)
    def _init():
        acc_ref[...] = jnp.zeros_like(acc_ref)

    pred = pred_ref[...].astype(jnp.float32)          # (tile_n, C); bf16 -> f32 in-reg
    tile_n, c = pred.shape

    # Lane-dense target row (1, tile_n) -> column (tile_n, 1): small XLU relayout.
    tgt_col = jnp.transpose(tgt_ref[...], (1, 0))     # (tile_n, 1) int32

    # VPU masked gather: padded / out-of-range rows carry target == -1, so they
    # select 0 regardless of whatever (stale) pred data sits in the ragged tail.
    class_iota = lax.broadcasted_iota(jnp.int32, (tile_n, c), 1)
    masked = jnp.where(class_iota == tgt_col, pred, 0.0)          # (tile_n, C)

    # Pure vreg adds in the hot loop; tiny (1, C) lane accumulator.
    acc_ref[...] += jnp.sum(masked, axis=0, keepdims=True)

    @pl.when(i == n_inner - 1)
    def _finalize():
        # Single cross-lane reduce per split.
        out_ref[0, 0] = -jnp.sum(acc_ref[...]) * inv_n


def _reg_kernel(trans_ref, out_ref):
    # feature_transform_reguliarzer: mean_b || A_b @ A_b^T - I ||_F
    trans = trans_ref[...].astype(jnp.float32)                    # (B, K, K)
    b, k, _ = trans.shape
    gram = jnp.einsum('bij,bkj->bik', trans, trans,
                      preferred_element_type=jnp.float32,
                      precision=lax.Precision.HIGHEST)            # exact-ish f32
    rows = lax.broadcasted_iota(jnp.int32, (k, k), 0)
    cols = lax.broadcasted_iota(jnp.int32, (k, k), 1)
    eye = (rows == cols).astype(jnp.float32)[None, :, :]
    diff = gram - eye
    sq = jnp.sum(diff * diff, axis=2)                             # (B, K)
    per_batch = jnp.sqrt(jnp.sum(sq, axis=1, keepdims=True))      # (B, 1)
    out_ref[0, 0] = jnp.sum(per_batch) / jnp.float32(b)


def get_loss(pred, target, trans_feat, mat_diff_loss_scale=MAT_DIFF_LOSS_SCALE,
             *, tile_rows=4096, n_split=None):
    # TODO(synk): F.nll_loss's ignore_index=-100 / class weights are not handled
    # (the module's defaults never use them).
    pred = jnp.asarray(pred)
    target = jnp.asarray(target)
    trans_feat = jnp.asarray(trans_feat)

    n, c = pred.shape
    b, k, k2 = trans_feat.shape
    assert k == k2

    # ---- row-tile sizing: big tiles (DMA-dominated steps), bounded so the
    # double-buffered pred block stays <= ~8 MiB (fits every generation's
    # scoped-VMEM default, incl. v7x's 32 MiB, with no vmem_limit override).
    c_lanes = max(128, _round_up(c, 128))             # C pads to 128 lanes in VMEM
    itemsize = jnp.dtype(pred.dtype).itemsize
    budget_bytes = 8 * 1024 * 1024
    rows_budget = budget_bytes // (2 * c_lanes * max(1, itemsize))
    tile_n = min(int(tile_rows), int(rows_budget), _round_up(n, 32))
    tile_n = max(32, (tile_n // 32) * 32)             # multiple of 32 (bf16/int8 safe)

    tiles_total = pl.cdiv(n, tile_n)

    # ---- megacore split: only when >1 TC and the halves are exactly balanced.
    if n_split is None:
        n_split = _num_tensorcores()
    n_split = max(1, int(n_split))
    if tiles_total % n_split != 0:
        n_split = 1
    tiles_per_split = tiles_total // n_split

    # ---- target: lane-dense (tiles_total, tile_n) int32; pad ONLY the target
    # (cheap) with -1; pred is never copied/padded in HBM.
    n_rows_padded = tiles_total * tile_n
    tgt = target.astype(jnp.int32)
    if n_rows_padded != n:
        tgt = jnp.pad(tgt, (0, n_rows_padded - n), constant_values=-1)
    tgt2d = tgt.reshape(tiles_total, tile_n)

    kernel = functools.partial(_nll_kernel, inv_n=1.0 / float(n))
    tps = tiles_per_split

    partial_nll = pl.pallas_call(
        kernel,
        out_shape=jax.ShapeDtypeStruct((n_split, 1), jnp.float32),
        grid_spec=pltpu.PrefetchScalarGridSpec(
            num_scalar_prefetch=0,
            grid=(n_split, tiles_per_split),
            in_specs=[
                # pred: native dtype, double-buffered (default) big row tile.
                pl.BlockSpec((tile_n, c), lambda s, i: (s * tps + i, 0)),
                # target: lane-dense (1, tile_n) row per tile.
                pl.BlockSpec((1, tile_n), lambda s, i: (s * tps + i, 0)),
            ],
            out_specs=pl.BlockSpec((1, 1), lambda s, i: (s, 0),
                                   memory_space=pltpu.MemorySpace.SMEM),
            scratch_shapes=[pltpu.VMEM((1, c), jnp.float32)],
        ),
        compiler_params=pltpu.CompilerParams(
            dimension_semantics=("parallel", "arbitrary")),
        cost_estimate=pl.CostEstimate(
            flops=int(2 * n * c),
            transcendentals=0,
            bytes_accessed=int(n * c * itemsize + n_rows_padded * 4)),
    )(pred, tgt2d)

    # ---- regularizer: tiny single-shot pallas_call (hoisted out of the NLL
    # pipeline; no resident (B,K,K) block / serial tail on the hot grid).
    reg = pl.pallas_call(
        _reg_kernel,
        out_shape=jax.ShapeDtypeStruct((1, 1), jnp.float32),
        grid=(1,),
        in_specs=[pl.BlockSpec((b, k, k), lambda i: (0, 0, 0))],
        out_specs=pl.BlockSpec((1, 1), lambda i: (0, 0),
                               memory_space=pltpu.MemorySpace.SMEM),
    )(trans_feat)

    return jnp.sum(partial_nll) + reg[0, 0] * jnp.float32(mat_diff_loss_scale)


def _reference(pred, target, trans_feat):
    # Pure-JAX reference for sanity checking.
    nll = -jnp.mean(pred[jnp.arange(pred.shape[0]), target])
    K = trans_feat.shape[1]
    gram = jnp.einsum('bij,bkj->bik', trans_feat, trans_feat, precision='highest')
    diff = gram - jnp.eye(K, dtype=trans_feat.dtype)[None]
    mat = jnp.mean(jnp.sqrt(jnp.sum(diff * diff, axis=(1, 2))))
    return nll + mat * MAT_DIFF_LOSS_SCALE


if __name__ == "__main__":
    key = jax.random.PRNGKey(0)
    k1, k2, k3 = jax.random.split(key, 3)

    B, NPTS, C, K = 2, 64, 16, 64          # pred is (B*NPTS, C) in part-seg
    N = B * NPTS

    logits = jax.random.normal(k1, (N, C), dtype=jnp.float32)
    pred = jax.nn.log_softmax(logits, axis=-1)             # log-probs, as nll_loss expects
    target = jax.random.randint(k2, (N,), 0, C, dtype=jnp.int32)
    trans_feat = jax.random.normal(k3, (B, K, K), dtype=jnp.float32) * 0.1

    total = get_loss(pred, target, trans_feat)
    total = jax.block_until_ready(total)

    ref = _reference(pred, target, trans_feat)
    assert jnp.allclose(total, ref, rtol=1e-4, atol=1e-4), (total, ref)

    print("KERNEL_OK")
</pallas_src>

<mosaic_0001>
module attributes {stable_mosaic.version = 11 : i64} {
  func.func @_nll_kernel(%arg0: i32, %arg1: i32, %arg2: memref<128x16xf32, #tpu.memory_space<vmem>>, %arg3: memref<1x128xi32, #tpu.memory_space<vmem>>, %arg4: memref<1x1xf32, #tpu.memory_space<smem>>, %arg5: memref<1x16xf32, #tpu.memory_space<vmem>>) attributes {dimension_semantics = [#tpu.dimension_semantics<parallel>, #tpu.dimension_semantics<arbitrary>], iteration_bounds = array<i64: 1, 1>, scalar_prefetch = 0 : i64, scratch_operands = 1 : i64, tpu.core_type = #tpu.core_type<tc>, window_params = [{transform_indices = @transform_0, window_bounds = array<i64: 128, 16>}, {transform_indices = @transform_1, window_bounds = array<i64: 1, 128>}, {transform_indices = @transform_2, window_bounds = array<i64: 1, 1>}]} {
    %c0_i32 = arith.constant 0 : i32
    %0 = arith.cmpi eq, %arg1, %c0_i32 : i32
    %1 = arith.extui %0 : i1 to i32
    %c0_i32_0 = arith.constant 0 : i32
    %2 = arith.cmpi ne, %1, %c0_i32_0 : i32
    scf.if %2 {
      %cst_11 = arith.constant 0.000000e+00 : f32
      %19 = vector.broadcast %cst_11 : f32 to vector<1x16xf32>
      %c0_12 = arith.constant 0 : index
      %c0_13 = arith.constant 0 : index
      %20 = vector.load %arg5[%c0_12, %c0_13] : memref<1x16xf32, #tpu.memory_space<vmem>>, vector<1x16xf32>
      tpu.vector_store %arg5[%c0_12, %c0_13], %19 {strides = array<i32>} : memref<1x16xf32, #tpu.memory_space<vmem>>, vector<1x16xf32>,
    } else {
    }
    %c0 = arith.constant 0 : index
    %c0_1 = arith.constant 0 : index
    %3 = vector.load %arg2[%c0, %c0_1] : memref<128x16xf32, #tpu.memory_space<vmem>>, vector<128x16xf32>
    %c0_2 = arith.constant 0 : index
    %c0_3 = arith.constant 0 : index
    %4 = vector.load %arg3[%c0_2, %c0_3] : memref<1x128xi32, #tpu.memory_space<vmem>>, vector<1x128xi32>
    %5 = tpu.transpose %4, [1, 0] : vector<1x128xi32> -> vector<128x1xi32>
    %6 = tpu.iota {dimensions = array<i32: 1>} : vector<128x16xi32>
    %7 = vector.broadcast %5 : vector<128x1xi32> to vector<128x16xi32>
    %8 = arith.cmpi eq, %6, %7 : vector<128x16xi32>
    %cst = arith.constant 0.000000e+00 : f32
    %9 = vector.broadcast %cst : f32 to vector<128x16xf32>
    %10 = arith.select %8, %3, %9 : vector<128x16xi1>, vector<128x16xf32>
    %c0_4 = arith.constant 0 : index
    %c0_5 = arith.constant 0 : index
    %11 = vector.load %arg5[%c0_4, %c0_5] : memref<1x16xf32, #tpu.memory_space<vmem>>, vector<1x16xf32>
    %cst_6 = arith.constant dense<0.000000e+00> : vector<16xf32>
    %12 = vector.multi_reduction <add>, %10, %cst_6 [0] : vector<128x16xf32> to vector<16xf32>
    %13 = vector.shape_cast %12 : vector<16xf32> to vector<1x16xf32>
    %14 = arith.addf %11, %13 : vector<1x16xf32>
    %c0_7 = arith.constant 0 : index
    %c0_8 = arith.constant 0 : index
    %15 = vector.load %arg5[%c0_7, %c0_8] : memref<1x16xf32, #tpu.memory_space<vmem>>, vector<1x16xf32>
    tpu.vector_store %arg5[%c0_7, %c0_8], %14 {strides = array<i32>} : memref<1x16xf32, #tpu.memory_space<vmem>>, vector<1x16xf32>,
    %c0_i32_9 = arith.constant 0 : i32
    %16 = arith.cmpi eq, %arg1, %c0_i32_9 : i32
    %17 = arith.extui %16 : i1 to i32
    %c0_i32_10 = arith.constant 0 : i32
    %18 = arith.cmpi ne, %17, %c0_i32_10 : i32
    scf.if %18 {
      %c0_11 = arith.constant 0 : index
      %c0_12 = arith.constant 0 : index
      %19 = vector.load %arg5[%c0_11, %c0_12] : memref<1x16xf32, #tpu.memory_space<vmem>>, vector<1x16xf32>
      %20 = vector.shape_cast %19 : vector<1x16xf32> to vector<1x1x16xf32>
      %cst_13 = arith.constant dense<0.000000e+00> : vector<1xf32>
      %21 = vector.multi_reduction <add>, %20, %cst_13 [1, 2] : vector<1x1x16xf32> to vector<1xf32>
      %22 = vector.shape_cast %21 : vector<1xf32> to vector<1x1x1xf32>
      %23 = vector.extract %22[0, 0, 0] : f32 from vector<1x1x1xf32>
      %cst_14 = arith.constant 0.000000e+00 : f32
      %24 = arith.subf %cst_14, %23 : f32
      %cst_15 = arith.constant 7.812500e-03 : f32
      %25 = arith.mulf %24, %cst_15 : f32
      %c0_16 = arith.constant 0 : index
      %c0_17 = arith.constant 0 : index
      %26 = memref.load %arg4[%c0_16, %c0_17] : memref<1x1xf32, #tpu.memory_space<smem>>
      memref.store %25, %arg4[%c0_16, %c0_17] : memref<1x1xf32, #tpu.memory_space<smem>>
    } else {
    }
    return
  }
  func.func @transform_0(%arg0: i32, %arg1: i32) -> (i32, i32) {
    %c1_i32 = arith.constant 1 : i32
    %0 = arith.muli %arg0, %c1_i32 : i32
    %1 = arith.addi %0, %arg1 : i32
    %c0_i32 = arith.constant 0 : i32
    %c0_i32_0 = arith.constant 0 : i32
    return %1, %c0_i32 : i32, i32
  }
  func.func @transform_1(%arg0: i32, %arg1: i32) -> (i32, i32) {
    %c1_i32 = arith.constant 1 : i32
    %0 = arith.muli %arg0, %c1_i32 : i32
    %1 = arith.addi %0, %arg1 : i32
    %c0_i32 = arith.constant 0 : i32
    %c0_i32_0 = arith.constant 0 : i32
    return %1, %c0_i32 : i32, i32
  }
  func.func @transform_2(%arg0: i32, %arg1: i32) -> (i32, i32) {
    %c0_i32 = arith.constant 0 : i32
    %c0_i32_0 = arith.constant 0 : i32
    return %arg0, %c0_i32 : i32, i32
  }
}

</mosaic_0001>

<bundles_post_ra>
// kernel: tpu_custom_call.1
= control target key start
LH: loop header
LB: loop body
LE: loop exit
PB: predicated region body
PF: predicated region fallthrough
CT: control target
= control target key end

     0   :  { %s393_s0 = inlined_call_operand.vmem [shape: f32[128,16], index: 0, kind: input, shape index: {}]   ;;  %s394_s1 = inlined_call_operand.vmem [shape: s32[1,128], index: 1, kind: input, shape index: {}]   ;;  %s395_s2 = inlined_call_operand.hbm [shape: f32[1,1], index: 2, kind: output, shape index: {}]  }
   0x1   :  { %v70_v0 = vld [vmem:[%s394_s1] sm:$0x1] }
   0x2   :  { %7 = vsyncpa [#allocation4], 0  ;;  %71 = vxpose.xlu0.b32.start.end [1/1] (short) %v70_v0, 128  ;;  %v284_v1 = vmov 0   ;;  %vm52_vm0 = vcmask 122880   ;;  %v285_v18 = vmov 0.0   ;;  %v103_v24 = vlaneseq  ;;  %v55_v28 = vld [vmem:[%s393_s0 + $0x8] sm:$0xff] }
   0x3   :  { %273 = vset.pattern.permute.xlu1 %v284_v1  ;;  %53 = vst.msk [vmem:[#allocation2] sm:$0x1] %vm52_vm0, %v285_v18  ;;  %v54_v30 = vld [vmem:[%s393_s0] sm:$0xff]  ;;  %v56_v31 = vld [vmem:[%s393_s0 + $0x10] sm:$0xff]  ;;  %v57_v33 = vld [vmem:[%s393_s0 + $0x18] sm:$0xff]  ;;  %vm186_vm5 = vcmask 130048  }
   0x4   :  { %v306_v26 = vand.u32 127, %v103_v24  ;;  %v58_v38 = vld [vmem:[%s393_s0 + $0x20] sm:$0xff]  ;;  %v59_v42 = vld [vmem:[%s393_s0 + $0x28] sm:$0xff]  ;;  %v60_v47 = vld [vmem:[%s393_s0 + $0x30] sm:$0xff]  ;;  %s286_s15 = smov [#allocation3]  }
   0x5   :  { %v61_v51 = vld [vmem:[%s393_s0 + $0x38] sm:$0xff]  ;;  %v62_v56 = vld [vmem:[%s393_s0 + $0x40] sm:$0xff]  ;;  %v63_v60 = vld [vmem:[%s393_s0 + $0x48] sm:$0xff] }
  0x2b   :  { %272 = vset.pattern.permute.xlu0 %v284_v1  ;;  %v64_v1 = vld [vmem:[%s393_s0 + $0x50] sm:$0xff] }
  0x7e   :  { %v87_v2 = vpop.trf.xlu0 }
  0x7f   :  { %106 = vperm.xlu0 %272, %v87_v2  }
  0x82   :  { %v88_v3 = vpop.trf.xlu0 }
  0x83   :  { %109 = vperm.xlu1 %273, %v88_v3  }
  0x86   :  { %v89_v4 = vpop.trf.xlu0 }
  0x87   :  { %112 = vperm.xlu1 %273, %v89_v4  }
  0x8a   :  { %v90_v5 = vpop.trf.xlu0 }
  0x8b   :  { %115 = vperm.xlu1 %273, %v90_v5   ;;  %v65_v5 = vld [vmem:[%s393_s0 + $0x58] sm:$0xff] }
  0x8e   :  { %v91_v6 = vpop.trf.xlu0 }
  0x8f   :  { %118 = vperm.xlu1 %273, %v91_v6  }
  0x92   :  { %v92_v7 = vpop.trf.xlu0 }
  0x93   :  { %121 = vperm.xlu1 %273, %v92_v7  }
  0x96   :  { %v93_v8 = vpop.trf.xlu0 }
  0x97   :  { %124 = vperm.xlu1 %273, %v93_v8  }
  0x9a   :  { %v94_v9 = vpop.trf.xlu0 }
  0x9b   :  { %127 = vperm.xlu1 %273, %v94_v9  }
  0x9e   :  { %v95_v10 = vpop.trf.xlu0 }
  0x9f   :  { %130 = vperm.xlu1 %273, %v95_v10   ;;  %v66_v10 = vld [vmem:[%s393_s0 + $0x60] sm:$0xff] }
  0xa2   :  { %v96_v11 = vpop.trf.xlu0 }
  0xa3   :  { %133 = vperm.xlu1 %273, %v96_v11  }
  0xa6   :  { %v97_v12 = vpop.trf.xlu0 }
  0xa7   :  { %136 = vperm.xlu1 %273, %v97_v12  }
  0xaa   :  { %v98_v13 = vpop.trf.xlu0 }
  0xab   :  { %139 = vperm.xlu1 %273, %v98_v13  }
  0xae   :  { %v99_v14 = vpop.trf.xlu0 }
  0xaf   :  { %142 = vperm.xlu1 %273, %v99_v14   ;;  %v67_v14 = vld [vmem:[%s393_s0 + $0x68] sm:$0xff] }
  0xb2   :  { %v100_v15 = vpop.trf.xlu0 }
  0xb3   :  { %145 = vperm.xlu1 %273, %v100_v15  }
  0xb6   :  { %v101_v16 = vpop.trf.xlu0 }
  0xb7   :  { %148 = vperm.xlu1 %273, %v101_v16  }
  0xba   :  { %v102_v17 = vpop.trf.xlu0 }
  0xbb   :  { %151 = vperm.xlu1 %273, %v102_v17  }
  0xfa   :  { %v107_v27 = vpop.permute.xlu0 %106 }
  0xfb   :  { %vm153_vm2 = vcmp.eq.s32.totalorder %v306_v26, %v107_v27 }
  0xfc   :  { %v169_v34 = vsel %vm153_vm2, %v54_v30, 0.0  ;;  %v69_v30 = vld [vmem:[%s393_s0 + $0x78] sm:$0xff] }
  0xfd   :  { %v187_v40 = vsel %vm186_vm5, %v169_v34, 0.0 }
  0xfe   :  { %v110_v19 = vpop.permute.xlu1 %109 }
  0xff   :  { %vm154_vm1 = vcmp.eq.s32.totalorder %v306_v26, %v110_v19 }
 0x100   :  { %v170_v32 = vsel %vm154_vm1, %v55_v28, 0.0 }
 0x101   :  { %v188_v37 = vsel %vm186_vm5, %v170_v32, 0.0 }
 0x102   :  { %v113_v20 = vpop.permute.xlu1 %112  ;;  %v189_v43 = vadd.f32 %v188_v37, %v187_v40 }
 0x103   :  { %vm155_vm3 = vcmp.eq.s32.totalorder %v306_v26, %v113_v20 }
 0x104   :  { %v171_v35 = vsel %vm155_vm3, %v56_v31, 0.0 }
 0x105   :  { %v190_v41 = vsel %vm186_vm5, %v171_v35, 0.0 }
 0x106   :  { %v116_v21 = vpop.permute.xlu1 %115  ;;  %v191_v48 = vadd.f32 %v190_v41, %v189_v43 }
 0x107   :  { %vm156_vm4 = vcmp.eq.s32.totalorder %v306_v26, %v116_v21 }
 0x108   :  { %v172_v39 = vsel %vm156_vm4, %v57_v33, 0.0 }
 0x109   :  { %v192_v46 = vsel %vm186_vm5, %v172_v39, 0.0 }
 0x10a   :  { %v119_v22 = vpop.permute.xlu1 %118  ;;  %v193_v52 = vadd.f32 %v192_v46, %v191_v48 }
 0x10b   :  { %vm157_vm6 = vcmp.eq.s32.totalorder %v306_v26, %v119_v22  ;;  %v68_v22 = vld [vmem:[%s393_s0 + $0x70] sm:$0xff] }
 0x10c   :  { %v173_v44 = vsel %vm157_vm6, %v58_v38, 0.0 }
 0x10d   :  { %v194_v50 = vsel %vm186_vm5, %v173_v44, 0.0 }
 0x10e   :  { %v122_v23 = vpop.permute.xlu1 %121  ;;  %v195_v57 = vadd.f32 %v194_v50, %v193_v52 }
 0x10f   :  { %vm158_vm7 = vcmp.eq.s32.totalorder %v306_v26, %v122_v23 }
 0x110   :  { %v174_v49 = vsel %vm158_vm7, %v59_v42, 0.0  ;;  %v185_v42 = vld [vmem:[#allocation2] sm:$0x1] }
 0x111   :  { %v196_v55 = vsel %vm186_vm5, %v174_v49, 0.0 }
 0x112   :  { %v125_v25 = vpop.permute.xlu1 %124  ;;  %v197_v61 = vadd.f32 %v196_v55, %v195_v57 }
 0x113   :  { %vm159_vm8 = vcmp.eq.s32.totalorder %v306_v26, %v125_v25 }
 0x114   :  { %v175_v53 = vsel %vm159_vm8, %v60_v47, 0.0 }
 0x115   :  { %v198_v59 = vsel %vm186_vm5, %v175_v53, 0.0 }
 0x116   :  { %v128_v29 = vpop.permute.xlu1 %127  ;;  %v199_v2 = vadd.f32 %v198_v59, %v197_v61 }
 0x117   :  { %vm160_vm9 = vcmp.eq.s32.totalorder %v306_v26, %v128_v29 }
 0x118   :  { %v176_v58 = vsel %vm160_vm9, %v61_v51, 0.0 }
 0x119   :  { %v200_v0 = vsel %vm186_vm5, %v176_v58, 0.0 }
 0x11a   :  { %v131_v36 = vpop.permute.xlu1 %130  ;;  %v201_v6 = vadd.f32 %v200_v0, %v199_v2 }
 0x11b   :  { %vm161_vm10 = vcmp.eq.s32.totalorder %v306_v26, %v131_v36 }
 0x11c   :  { %v177_v62 = vsel %vm161_vm10, %v62_v56, 0.0 }
 0x11d   :  { %v202_v4 = vsel %vm186_vm5, %v177_v62, 0.0 }
 0x11e   :  { %v134_v45 = vpop.permute.xlu1 %133  ;;  %v203_v11 = vadd.f32 %v202_v4, %v201_v6 }
 0x11f   :  { %vm162_vm11 = vcmp.eq.s32.totalorder %v306_v26, %v134_v45 }
 0x120   :  { %v178_v3 = vsel %vm162_vm11, %v63_v60, 0.0 }
 0x121   :  { %v204_v9 = vsel %vm186_vm5, %v178_v3, 0.0 }
 0x122   :  { %v137_v54 = vpop.permute.xlu1 %136  ;;  %v205_v15 = vadd.f32 %v204_v9, %v203_v11 }
 0x123   :  { %vm163_vm12 = vcmp.eq.s32.totalorder %v306_v26, %v137_v54 }
 0x124   :  { %v179_v7 = vsel %vm163_vm12, %v64_v1, 0.0 }
 0x125   :  { %v206_v13 = vsel %vm186_vm5, %v179_v7, 0.0 }
 0x126   :  { %v140_v63 = vpop.permute.xlu1 %139  ;;  %v207_v19 = vadd.f32 %v206_v13, %v205_v15 }
 0x127   :  { %vm164_vm13 = vcmp.eq.s32.totalorder %v306_v26, %v140_v63 }
 0x128   :  { %v180_v12 = vsel %vm164_vm13, %v65_v5, 0.0 }
 0x129   :  { %v208_v18 = vsel %vm186_vm5, %v180_v12, 0.0 }
 0x12a   :  { %v143_v8 = vpop.permute.xlu1 %142  ;;  %v209_v23 = vadd.f32 %v208_v18, %v207_v19 }
 0x12b   :  { %vm165_vm14 = vcmp.eq.s32.totalorder %v306_v26, %v143_v8 }
 0x12c   :  { %v181_v16 = vsel %vm165_vm14, %v66_v10, 0.0 }
 0x12d   :  { %v210_v21 = vsel %vm186_vm5, %v181_v16, 0.0 }
 0x12e   :  { %v146_v17 = vpop.permute.xlu1 %145  ;;  %v211_v27 = vadd.f32 %v210_v21, %v209_v23 }
 0x12f   :  { %vm166_vm15 = vcmp.eq.s32.totalorder %v306_v26, %v146_v17 }
 0x130   :  { %v182_v20 = vsel %vm166_vm15, %v67_v14, 0.0 }
 0x131   :  { %v212_v25 = vsel %vm186_vm5, %v182_v20, 0.0 }
 0x132   :  { %v149_v24 = vpop.permute.xlu1 %148  ;;  %v213_v31 = vadd.f32 %v212_v25, %v211_v27 }
 0x133   :  { %vm167_vm1 = vcmp.eq.s32.totalorder %v306_v26, %v149_v24 }
 0x134   :  { %v183_v28 = vsel %vm167_vm1, %v68_v22, 0.0 }
 0x135   :  { %v214_v29 = vsel %vm186_vm5, %v183_v28, 0.0 }
 0x136   :  { %v152_v32 = vpop.permute.xlu1 %151  ;;  %v215_v33 = vadd.f32 %v214_v29, %v213_v31 }
 0x137   :  { %vm168_vm2 = vcmp.eq.s32.totalorder %v306_v26, %v152_v32 }
 0x138   :  { %v184_v34 = vsel %vm168_vm2, %v69_v30, 0.0 }
 0x139   :  { %v216_v35 = vsel %vm186_vm5, %v184_v34, 0.0 }
 0x13a   :  { %v217_v36 = vadd.f32 %v216_v35, %v215_v33 }
 0x13c   :  { %v218_v37 = vrot.slane %v217_v36, 4 }
 0x13e   :  { %v219_v38 = vadd.f32 %v218_v37, %v217_v36 }
 0x140   :  { %v220_v39 = vrot.slane %v219_v38, 2 }
 0x142   :  { %v221_v40 = vadd.f32 %v220_v39, %v219_v38 }
 0x144   :  { %v222_v41 = vrot.slane %v221_v40, 1 }
 0x146   :  { %v223_v43 = vadd.f32 %v222_v41, %v221_v40 }
 0x148   :  { %v224_v44 = vadd.f32 %v223_v43, %v185_v42 }
 0x14a   :  { %226 = vst.msk [vmem:[#allocation2] sm:$0x1] %vm52_vm0, %v224_v44 }
 0x151   :  { %v230_v45 = vld [vmem:[#allocation2] sm:$0x1] }
 0x152   :  { %v231_v46 = vsel %vm52_vm0, %v230_v45, 0.0 }
 0x153   :  { %232 = vadd.xlane.f32.xlu1 %v231_v46 }
 0x1dc   :  { %v233_v26 = vpop.xlane.xlu1 %232 }
 0x1dd   :  { %v234_v47 = vrot.slane %v233_v26, 4 }
 0x1df   :  { %v235_v48 = vadd.f32 %v234_v47, %v233_v26 }
 0x1e1   :  { %v236_v49 = vrot.slane %v235_v48, 2 }
 0x1e3   :  { %v237_v50 = vadd.f32 %v236_v49, %v235_v48 }
 0x1e5   :  { %v238_v51 = vrot.slane %v237_v50, 1 }
 0x1e7   :  { %v239_v52 = vadd.f32 %v238_v51, %v237_v50 }
 0x1e9   :  { %267 = vpush %v239_v52 }
 0x21a   :  { %s268_s0 = spop %267 }
 0x21b   :  { %s241_s13 = ssub.f32 0.0, %s268_s0 }
 0x21d   :  { %s242_s14 = smul.f32 0.0078125, %s241_s13 }
 0x21f   :  { %244 = sst [smem:[#allocation3]] %s242_s14 }
 0x220   :  { %252 = dma.smem_to_hbm %s286_s15, 16, %s395_s2, [#allocation4]  }
 0x221   :  { %282 = dma.done.wait [#allocation4], 16  }
 0x222   :  { %283 = vsyncadd [#allocation4], 4294967280 }
 0x223   :  { %256 = sfence }
 0x224   :  { %257 = vsyncpa [#allocation4], 1 }

</bundles_post_ra>
